<compile_context>
chip_gen: v7x
topology: tpu7x:2x2x1
jax: 0.10.0
libtpu: 0.0.40
codegen_flags: <defaults>
</compile_context>

<pallas_src>
import jax
import jax.numpy as jnp
from jax.experimental import pallas as pl
from jax.experimental.pallas import tpu as pltpu


def _round_up(n, m):
    return ((n + m - 1) // m) * m


def tfa_fused_kernel(x_ref, wq_ref, bq_ref, wvt_ref, bvr_ref, o_ref):
    """One full image per batch item: block = (C, HW), HW unpadded (block == full extent).

    x_ref : (C, HW) native dtype.  Weights (tiny, f32, grid-resident):
      wq_ref : (C/2, C)   bq_ref : (C/2, 1)   wvt_ref : (C, C/2)   bvr_ref : (1, C/2)
    """
    x = x_ref[...]
    hw = x.shape[-1]

    # Global channel mean, computed in-kernel. Exact: the block covers the full,
    # unpadded spatial extent, so the lane reduce sees no padding lanes.
    xbar = jnp.sum(x.astype(jnp.float32), axis=-1, keepdims=True) * (1.0 / hw)   # (C, 1)

    # Query path: AdaptiveAvgPool2d(conv1x1(x)) == conv1x1(mean_hw(x)) (exact, incl. bias),
    # then softmax over the C/2 axis. Column-oriented to avoid any transposes.
    q = jnp.dot(wq_ref[...], xbar, preferred_element_type=jnp.float32) + bq_ref[...]  # (C/2,1)
    q = q - jnp.max(q, axis=0, keepdims=True)
    e = jnp.exp(q)
    sm = e / jnp.sum(e, axis=0, keepdims=True)                                    # (C/2, 1)

    # Value path, algebraically folded (exact):
    #   wz = sm^T (Wv x + bv) = (Wv^T sm)^T x + bv^T sm
    v = jnp.dot(wvt_ref[...], sm, preferred_element_type=jnp.float32)             # (C, 1)
    bias = jnp.dot(bvr_ref[...], sm, preferred_element_type=jnp.float32)          # (1, 1)

    xw = v.astype(x.dtype) * x                                                    # (C, HW)
    wz = jnp.sum(xw.astype(jnp.float32), axis=0, keepdims=True) + bias            # (1, HW) f32
    weight = jax.nn.sigmoid(wz).astype(o_ref.dtype)                               # (1, HW)
    o_ref[...] = weight * x                                                       # native-dtype epilogue


def tfa_tiled_kernel(x_ref, v_ref, bias_ref, o_ref):
    """Large-HW path: x tile (C, T); query path pre-folded in the wrapper.

    x_ref : (C, T) native dtype.  v_ref : (1, C) f32 = softmax(q) @ Wv.
    bias_ref : (1, 1) f32 = softmax(q) @ bv.
    NOTE: no op here reduces across the T (lane) axis, so the ragged last block's
    undefined padding lanes never contaminate valid outputs (OOB stores are masked).
    """
    x = x_ref[...]
    # v is cast to the streaming dtype for the MXU dot; accumulation stays f32.
    wz = jnp.dot(v_ref[...].astype(x.dtype), x,
                 preferred_element_type=jnp.float32) + bias_ref[...]              # (1, T) f32
    weight = jax.nn.sigmoid(wz).astype(o_ref.dtype)
    o_ref[...] = weight * x


def time_frequency_attention(x, w_v, b_v, w_q, b_q, *, tile_hw=32768):
    """x: (B, C, H, W) NCHW (same as PyTorch). Conv weights: (C/2, C, 1, 1), biases (C/2,).

    Streams x / writes out in x.dtype (pass bf16 for ~2x on this HBM-bound kernel);
    softmax / sigmoid / accumulations run in f32 inside the kernel.
    """
    b, c, h, w = x.shape
    c2 = c // 2
    hw = h * w
    itemsize = x.dtype.itemsize

    xf = x.reshape(b, c, hw)

    # 1x1-conv weights as plain (tiny) f32 matrices.
    wv2 = w_v.reshape(c2, c).astype(jnp.float32)       # (C/2, C)
    wq2 = w_q.reshape(c2, c).astype(jnp.float32)       # (C/2, C)
    bv2 = b_v.reshape(c2).astype(jnp.float32)          # (C/2,)
    bq2 = b_q.reshape(c2).astype(jnp.float32)          # (C/2,)

    # ---- tile selection --------------------------------------------------------------
    tile_hw = max(128, (int(tile_hw) // 128) * 128)
    # Keep double-buffered in+out blocks (4 * C * T * itemsize) well under v7x's 64 MiB VMEM.
    vmem_block_cap = 40 << 20
    max_t = max(128, ((vmem_block_cap // (4 * c * itemsize)) // 128) * 128)
    t = min(tile_hw, max_t)

    # v7x has 2 TensorCores per chip; make sure a batch-1 / small-HW case still yields
    # >= 2 grid steps so both cores get work. v5e/v6e (1 TC) keep the cheaper fused path.
    two_tc = False
    try:
        kind = jax.devices()[0].device_kind.lower()
        two_tc = ("v7" in kind) or ("7x" in kind)
    except Exception:
        pass

    fused = hw <= t  # whole image per batch item fits one block
    if fused and two_tc and b == 1 and hw > 128:
        fused = False
        t = _round_up(pl.cdiv(hw, 2), 128)

    block_lanes = hw if fused else t
    footprint = 4 * c * block_lanes * itemsize + (2 << 20)
    vmem_limit = int(min(max(footprint, 32 << 20), 48 << 20))

    if fused:
        # ---- fused path: grid = (B,), one (C, HW) block per batch item ----------------
        wvt = wv2.T                                     # (C, C/2)
        bq_col = bq2[:, None]                           # (C/2, 1)
        bv_row = bv2[None, :]                           # (1, C/2)
        out = pl.pallas_call(
            tfa_fused_kernel,
            out_shape=jax.ShapeDtypeStruct((b, c, hw), x.dtype),
            grid_spec=pltpu.PrefetchScalarGridSpec(
                num_scalar_prefetch=0,
                grid=(b,),
                in_specs=[
                    pl.BlockSpec((pl.Squeezed(), c, hw), lambda i: (i, 0, 0)),  # x (full image)
                    pl.BlockSpec((c2, c), lambda i: (0, 0)),                    # Wq
                    pl.BlockSpec((c2, 1), lambda i: (0, 0)),                    # bq (col)
                    pl.BlockSpec((c, c2), lambda i: (0, 0)),                    # Wv^T
                    pl.BlockSpec((1, c2), lambda i: (0, 0)),                    # bv (row)
                ],
                out_specs=pl.BlockSpec((pl.Squeezed(), c, hw), lambda i: (i, 0, 0)),
            ),
            compiler_params=pltpu.CompilerParams(
                dimension_semantics=("parallel",),
                vmem_limit_bytes=vmem_limit),
        )(xf, wq2, bq_col, wvt, bv_row)
    else:
        # ---- tiled path: query path hoisted to the wrapper (tiny per-batch XLA work) ---
        xbar = jnp.mean(xf, axis=2, dtype=jnp.float32)                    # (B, C)
        q = xbar @ wq2.T + bq2[None, :]                                   # (B, C/2)
        sm = jax.nn.softmax(q, axis=-1)                                   # (B, C/2)
        vrow = sm @ wv2                                                   # (B, C)  == sm @ Wv
        bias = sm @ bv2[:, None]                                          # (B, 1)  == sm @ bv
        v3 = vrow[:, None, :]                                             # (B, 1, C)
        bias3 = bias[:, None, :]                                          # (B, 1, 1)

        grid = (b, pl.cdiv(hw, t))                                        # ragged last tile OK
        out = pl.pallas_call(
            tfa_tiled_kernel,
            out_shape=jax.ShapeDtypeStruct((b, c, hw), x.dtype),
            grid_spec=pltpu.PrefetchScalarGridSpec(
                num_scalar_prefetch=0,
                grid=grid,
                in_specs=[
                    pl.BlockSpec((pl.Squeezed(), c, t), lambda i, j: (i, 0, j)),  # x tile
                    pl.BlockSpec((pl.Squeezed(), 1, c), lambda i, j: (i, 0, 0)),  # folded v
                    pl.BlockSpec((pl.Squeezed(), 1, 1), lambda i, j: (i, 0, 0)),  # folded bias
                ],
                out_specs=pl.BlockSpec((pl.Squeezed(), c, t), lambda i, j: (i, 0, j)),
            ),
            compiler_params=pltpu.CompilerParams(
                dimension_semantics=("parallel", "parallel"),
                vmem_limit_bytes=vmem_limit),
        )(xf, v3, bias3)

    return out.reshape(b, c, h, w)


def _reference(x, w_v, b_v, w_q, b_q):
    """Pure-JAX reference mirroring the PyTorch forward exactly (f32)."""
    b, c, h, w = x.shape
    wv_m = w_v.reshape(c // 2, c)
    wq_m = w_q.reshape(c // 2, c)
    spatial_wv = jnp.einsum("oc,bchw->bohw", wv_m, x) + b_v[None, :, None, None]
    spatial_wq = jnp.einsum("oc,bchw->bohw", wq_m, x) + b_q[None, :, None, None]
    spatial_wq = jnp.mean(spatial_wq, axis=(2, 3), keepdims=True)       # (b, c/2, 1, 1)
    spatial_wv = spatial_wv.reshape(b, c // 2, -1)                      # (b, c/2, hw)
    spatial_wq = jnp.transpose(spatial_wq, (0, 2, 3, 1)).reshape(b, 1, c // 2)
    spatial_wq = jax.nn.softmax(spatial_wq, axis=-1)
    spatial_wz = jnp.matmul(spatial_wq, spatial_wv)                     # (b, 1, hw)
    spatial_weight = jax.nn.sigmoid(spatial_wz.reshape(b, 1, h, w))
    return spatial_weight * x


if __name__ == "__main__":
    channel = 32            # matches nn.Conv2d channel config
    B, C, H, W = 2, channel, 16, 16

    key = jax.random.PRNGKey(0)
    kx, kwv, kbv, kwq, kbq = jax.random.split(key, 5)
    x = jax.random.normal(kx, (B, C, H, W), dtype=jnp.float32)
    # Deterministic synthetic params (Conv2d(C, C/2, 1) shapes)
    w_v = 0.1 * jax.random.normal(kwv, (C // 2, C, 1, 1), dtype=jnp.float32)
    b_v = 0.1 * jax.random.normal(kbv, (C // 2,), dtype=jnp.float32)
    w_q = 0.1 * jax.random.normal(kwq, (C // 2, C, 1, 1), dtype=jnp.float32)
    b_q = 0.1 * jax.random.normal(kbq, (C // 2,), dtype=jnp.float32)

    ref = _reference(x, w_v, b_v, w_q, b_q)

    # 1) f32, fused path (whole 16x16 image per batch item, in-kernel mean)
    out = jax.block_until_ready(time_frequency_attention(x, w_v, b_v, w_q, b_q))
    assert out.shape == (B, C, H, W)
    assert jnp.allclose(out, ref, atol=1e-5, rtol=1e-5), "f32 fused mismatch vs reference"

    # 2) f32, tiled path (tile_hw=128 forces the (B, HW//T) grid + hoisted query path)
    out_t = jax.block_until_ready(
        time_frequency_attention(x, w_v, b_v, w_q, b_q, tile_hw=128))
    assert jnp.allclose(out_t, ref, atol=1e-5, rtol=1e-5), "tiled mismatch vs reference"

    # 3) non-multiple-of-128 spatial extent, fused path (block == full unpadded extent)
    x2 = jax.random.normal(key, (B, C, 10, 12), dtype=jnp.float32)
    ref2 = _reference(x2, w_v, b_v, w_q, b_q)
    out2 = jax.block_until_ready(time_frequency_attention(x2, w_v, b_v, w_q, b_q))
    assert jnp.allclose(out2, ref2, atol=1e-5, rtol=1e-5), "unaligned fused mismatch"

    # 4) non-multiple-of-128 spatial extent, tiled path with a ragged last block
    x3 = jax.random.normal(kx, (B, C, 10, 30), dtype=jnp.float32)       # hw = 300
    ref3 = _reference(x3, w_v, b_v, w_q, b_q)
    out3 = jax.block_until_ready(
        time_frequency_attention(x3, w_v, b_v, w_q, b_q, tile_hw=128))
    assert jnp.allclose(out3, ref3, atol=1e-5, rtol=1e-5), "ragged tiled mismatch"

    # 5) batch-1 case (exercises the v7x two-TensorCore split when running on v7x)
    ref1 = _reference(x[:1], w_v, b_v, w_q, b_q)
    out1 = jax.block_until_ready(time_frequency_attention(x[:1], w_v, b_v, w_q, b_q))
    assert jnp.allclose(out1, ref1, atol=1e-5, rtol=1e-5), "batch-1 mismatch"

    # 6) bf16 streaming (biggest lever on this HBM-bound kernel); loose tolerance
    out_bf = jax.block_until_ready(
        time_frequency_attention(x.astype(jnp.bfloat16), w_v, b_v, w_q, b_q))
    assert out_bf.dtype == jnp.bfloat16
    assert jnp.allclose(out_bf.astype(jnp.float32), ref, atol=1e-1, rtol=1e-1), \
        "bf16 mismatch vs reference"

    print("KERNEL_OK")
</pallas_src>

<mosaic_0001>
module attributes {stable_mosaic.version = 11 : i64} {
  func.func @tfa_fused_kernel(%arg0: i32, %arg1: memref<1x32x256xf32, #tpu.memory_space<vmem>>, %arg2: memref<16x32xf32, #tpu.memory_space<vmem>>, %arg3: memref<16x1xf32, #tpu.memory_space<vmem>>, %arg4: memref<32x16xf32, #tpu.memory_space<vmem>>, %arg5: memref<1x16xf32, #tpu.memory_space<vmem>>, %arg6: memref<1x32x256xf32, #tpu.memory_space<vmem>>) attributes {dimension_semantics = [#tpu.dimension_semantics<parallel>], iteration_bounds = array<i64: 2>, scalar_prefetch = 0 : i64, scratch_operands = 0 : i64, tpu.core_type = #tpu.core_type<tc>, window_params = [{transform_indices = @transform_0, window_bounds = array<i64: 1, 32, 256>}, {pipeline_mode = #tpu.pipeline_mode<synchronous>, transform_indices = @transform_1, window_bounds = array<i64: 16, 32>}, {pipeline_mode = #tpu.pipeline_mode<synchronous>, transform_indices = @transform_2, window_bounds = array<i64: 16, 1>}, {pipeline_mode = #tpu.pipeline_mode<synchronous>, transform_indices = @transform_3, window_bounds = array<i64: 32, 16>}, {pipeline_mode = #tpu.pipeline_mode<synchronous>, transform_indices = @transform_4, window_bounds = array<i64: 1, 16>}, {transform_indices = @transform_5, window_bounds = array<i64: 1, 32, 256>}]} {
    %c0 = arith.constant 0 : index
    %c0_0 = arith.constant 0 : index
    %c0_1 = arith.constant 0 : index
    %0 = vector.load %arg1[%c0, %c0_0, %c0_1] : memref<1x32x256xf32, #tpu.memory_space<vmem>>, vector<1x32x256xf32>
    %1 = vector.shape_cast %0 : vector<1x32x256xf32> to vector<32x256xf32>
    %cst = arith.constant dense<0.000000e+00> : vector<32xf32>
    %2 = vector.multi_reduction <add>, %1, %cst [1] : vector<32x256xf32> to vector<32xf32>
    %3 = vector.shape_cast %2 : vector<32xf32> to vector<32x1xf32>
    %cst_2 = arith.constant 3.906250e-03 : f32
    %4 = vector.broadcast %cst_2 : f32 to vector<32x1xf32>
    %5 = arith.mulf %3, %4 : vector<32x1xf32>
    %c0_3 = arith.constant 0 : index
    %c0_4 = arith.constant 0 : index
    %6 = vector.load %arg2[%c0_3, %c0_4] : memref<16x32xf32, #tpu.memory_space<vmem>>, vector<16x32xf32>
    %cst_5 = arith.constant dense<0.000000e+00> : vector<16x1xf32>
    %7 = tpu.matmul %6, %5, %cst_5 {dimension_numbers = #tpu.dot_dimension_numbers<[1], [0], [0], [1], [0, 0, 1, 1], [], []>} : vector<16x32xf32>, vector<32x1xf32>, vector<16x1xf32> -> vector<16x1xf32>
    %c0_6 = arith.constant 0 : index
    %c0_7 = arith.constant 0 : index
    %8 = vector.load %arg3[%c0_6, %c0_7] : memref<16x1xf32, #tpu.memory_space<vmem>>, vector<16x1xf32>
    %9 = arith.addf %7, %8 : vector<16x1xf32>
    %cst_8 = arith.constant dense<0xFF800000> : vector<1xf32>
    %10 = vector.multi_reduction <maximumf>, %9, %cst_8 [0] : vector<16x1xf32> to vector<1xf32>
    %11 = vector.shape_cast %10 : vector<1xf32> to vector<1x1xf32>
    %12 = vector.broadcast %11 : vector<1x1xf32> to vector<16x1xf32>
    %13 = arith.subf %9, %12 : vector<16x1xf32>
    %14 = math.exp %13 : vector<16x1xf32>
    %cst_9 = arith.constant dense<0.000000e+00> : vector<1xf32>
    %15 = vector.multi_reduction <add>, %14, %cst_9 [0] : vector<16x1xf32> to vector<1xf32>
    %16 = vector.shape_cast %15 : vector<1xf32> to vector<1x1xf32>
    %17 = vector.broadcast %16 : vector<1x1xf32> to vector<16x1xf32>
    %18 = arith.divf %14, %17 : vector<16x1xf32>
    %c0_10 = arith.constant 0 : index
    %c0_11 = arith.constant 0 : index
    %19 = vector.load %arg4[%c0_10, %c0_11] : memref<32x16xf32, #tpu.memory_space<vmem>>, vector<32x16xf32>
    %cst_12 = arith.constant dense<0.000000e+00> : vector<32x1xf32>
    %20 = tpu.matmul %19, %18, %cst_12 {dimension_numbers = #tpu.dot_dimension_numbers<[1], [0], [0], [1], [0, 0, 1, 1], [], []>} : vector<32x16xf32>, vector<16x1xf32>, vector<32x1xf32> -> vector<32x1xf32>
    %c0_13 = arith.constant 0 : index
    %c0_14 = arith.constant 0 : index
    %21 = vector.load %arg5[%c0_13, %c0_14] : memref<1x16xf32, #tpu.memory_space<vmem>>, vector<1x16xf32>
    %cst_15 = arith.constant dense<0.000000e+00> : vector<1x1xf32>
    %22 = tpu.matmul %21, %18, %cst_15 {dimension_numbers = #tpu.dot_dimension_numbers<[1], [0], [0], [1], [0, 0, 1, 1], [], []>} : vector<1x16xf32>, vector<16x1xf32>, vector<1x1xf32> -> vector<1x1xf32>
    %23 = vector.broadcast %20 : vector<32x1xf32> to vector<32x256xf32>
    %24 = arith.mulf %23, %1 : vector<32x256xf32>
    %cst_16 = arith.constant dense<0.000000e+00> : vector<256xf32>
    %25 = vector.multi_reduction <add>, %24, %cst_16 [0] : vector<32x256xf32> to vector<256xf32>
    %26 = vector.shape_cast %25 : vector<256xf32> to vector<1x256xf32>
    %27 = vector.broadcast %22 : vector<1x1xf32> to vector<1x256xf32>
    %28 = arith.addf %26, %27 : vector<1x256xf32>
    %29 = arith.negf %28 : vector<1x256xf32>
    %30 = math.exp %29 : vector<1x256xf32>
    %cst_17 = arith.constant 1.000000e+00 : f32
    %31 = vector.broadcast %cst_17 : f32 to vector<1x256xf32>
    %32 = arith.addf %31, %30 : vector<1x256xf32>
    %33 = arith.divf %31, %32 : vector<1x256xf32>
    %34 = vector.broadcast %33 : vector<1x256xf32> to vector<32x256xf32>
    %35 = arith.mulf %34, %1 : vector<32x256xf32>
    %c0_18 = arith.constant 0 : index
    %c0_19 = arith.constant 0 : index
    %c0_20 = arith.constant 0 : index
    %36 = vector.load %arg6[%c0_18, %c0_19, %c0_20] : memref<1x32x256xf32, #tpu.memory_space<vmem>>, vector<1x32x256xf32>
    %37 = vector.shape_cast %36 : vector<1x32x256xf32> to vector<32x256xf32>
    %38 = vector.shape_cast %35 : vector<32x256xf32> to vector<1x32x256xf32>
    tpu.vector_store %arg6[%c0_18, %c0_19, %c0_20], %38 {strides = array<i32>} : memref<1x32x256xf32, #tpu.memory_space<vmem>>, vector<1x32x256xf32>,
    return
  }
  func.func @transform_0(%arg0: i32) -> (i32, i32, i32) {
    %c0_i32 = arith.constant 0 : i32
    %c0_i32_0 = arith.constant 0 : i32
    %c0_i32_1 = arith.constant 0 : i32
    return %arg0, %c0_i32, %c0_i32_0 : i32, i32, i32
  }
  func.func @transform_1(%arg0: i32) -> (i32, i32) {
    %c0_i32 = arith.constant 0 : i32
    %c0_i32_0 = arith.constant 0 : i32
    %c0_i32_1 = arith.constant 0 : i32
    return %c0_i32, %c0_i32_0 : i32, i32
  }
  func.func @transform_2(%arg0: i32) -> (i32, i32) {
    %c0_i32 = arith.constant 0 : i32
    %c0_i32_0 = arith.constant 0 : i32
    %c0_i32_1 = arith.constant 0 : i32
    return %c0_i32, %c0_i32_0 : i32, i32
  }
  func.func @transform_3(%arg0: i32) -> (i32, i32) {
    %c0_i32 = arith.constant 0 : i32
    %c0_i32_0 = arith.constant 0 : i32
    %c0_i32_1 = arith.constant 0 : i32
    return %c0_i32, %c0_i32_0 : i32, i32
  }
  func.func @transform_4(%arg0: i32) -> (i32, i32) {
    %c0_i32 = arith.constant 0 : i32
    %c0_i32_0 = arith.constant 0 : i32
    %c0_i32_1 = arith.constant 0 : i32
    return %c0_i32, %c0_i32_0 : i32, i32
  }
  func.func @transform_5(%arg0: i32) -> (i32, i32, i32) {
    %c0_i32 = arith.constant 0 : i32
    %c0_i32_0 = arith.constant 0 : i32
    %c0_i32_1 = arith.constant 0 : i32
    return %arg0, %c0_i32, %c0_i32_0 : i32, i32, i32
  }
}

</mosaic_0001>

<bundles_post_ra>
// kernel: tpu_custom_call.1
= control target key start
LH: loop header
LB: loop body
LE: loop exit
PB: predicated region body
PF: predicated region fallthrough
CT: control target
= control target key end

     0   :  { %10 = vsyncpa [#allocation3], 0  ;;  %s1268_s0 = inlined_call_operand.hbm [shape: f32[2,32,256], index: 0, kind: input, shape index: {}]   ;;  %s1269_s1 = inlined_call_operand.vmem [shape: f32[16,32], index: 1, kind: input, shape index: {}]   ;;  %s1270_s2 = inlined_call_operand.vmem [shape: f32[16,1], index: 2, kind: input, shape index: {}]   ;;  %s1271_s3 = inlined_call_operand.vmem [shape: f32[32,16], index: 3, kind: input, shape index: {}]   ;;  %s1272_s4 = inlined_call_operand.vmem [shape: f32[1,16], index: 4, kind: input, shape index: {}]   ;;  %s1273_s5 = inlined_call_operand.hbm [shape: f32[2,32,256], index: 5, kind: output, shape index: {}]  }
   0x1   :  { %12 = vsyncpa [#allocation3 + $0x1], 0 }
   0x2   :  { %13 = vsyncpa [#allocation4], 0 }
   0x3   :  { %15 = vsyncpa [#allocation4 + $0x1], 0  ;;  %s1024_s18 = smov 0   ;;  %s1026_s19 = smov 0  }
   0x4   :  { %s1028_s20 = smov 0   ;;  %s1030_s21 = smov 0  }
   0x5 LB: > { %s1045_s22 = sadd.s32 4294967295, %s982_s21   ;;  %s733_s23 = sadd.s32 4294967294, %s982_s21   ;;  %s982_s21 = sphi %s1030_s21, %s1286_s21   ;;  %s978_s20 = sphi %s1028_s20, %s1285_s20   ;;  %s974_s19 = sphi %s1026_s19, %s1284_s19   ;;  %s970_s18 = sphi %s1024_s18, %s1283_s18  }
   0x6   : > { %s1049_s24 = sadd.s32 1, %s982_s21   ;;  %s28_s25 = sadd.s32 1, %s978_s20 }
   0x7   : > { %s25_s26 = ssub.s32 %s982_s21, %s1049_s24  ;;  %p35_p0 = scmp.ne.s32.totalorder %s978_s20, %s974_s19 }
   0x8   : > { %p26_p1 = scmp.eq.s32.totalorder %s25_s26, 0  ;;  %p36_p2 = scmp.eq.s32.totalorder %s982_s21, 0 }
   0x9   : > { %p41_p3 = scmp.ne.s32.totalorder %s974_s19, %s970_s18  ;;  %p42_p4 = scmp.eq.s32.totalorder %s1045_s22, 0 }
   0xa   : > { %s1061_s27 = scalar_select %p26_p1, %s978_s20, %s28_s25  }
   0xb   : > { %p1063_p5 = por %p36_p2, %p35_p0  ;;  %p1067_p6 = por %p42_p4, %p41_p3 }
   0xc   : > { %p149_p7 = scmp.eq.s32.totalorder %s1045_s22, 1  ;;  %p155_p8 = scmp.eq.s32.totalorder %s733_s23, 1 }
   0xd   : > { %p828_p10 = scmp.lt.s32.totalorder %s982_s21, 2  ;;  %s187_s7 = sand.u32 1, %s978_s20  }
   0xe   : > { %p1074_p11 = por %p149_p7, %p35_p0  ;;  %p1078_p12 = por %p155_p8, %p41_p3 }
   0xf   : > { %s756_s8 = sshll.u32 %s982_s21, 10  ;;  %s736_s9 = sshll.u32 %s187_s7, 6 }
  0x10   : > { %s1277_s30 = scalar_select %p1074_p11, 1, 0 }
  0x11   : > { %s1278_s6 = scalar_select %p1078_p12, 1, 0 }
  0x12   : > { %s1087_s12 = scalar_lea.hbm %s1268_s0, %s756_s8  ;;  %s191_s13 = scalar_lea.vmem [#allocation2], %s736_s9 }
  0x13   : > { %s198_s14 = sshll.u32 %s191_s13, 4  ;;  %p1091_p13 = pnand %p828_p10, %p1063_p5  ;;  %s1095_s14 = int_to_ptr.vmem [resolvable:$true] %s198_s14 }
  0x14   : > { %s1097_s16 = scalar_lea.sflag [#allocation3], %s187_s7  ;;  %s886_s17 = scalar_lea.hbm %s1087_s12, 1024 }
  0x15   : > { %p887_p0 = scmp.ne.s32.totalorder %s1087_s12, %s886_s17  ;;  %p888_p1 = pneg %p1091_p13 }
  0x16   : > { %s891_s26 = scalar_lea.hbm %s1268_s0, 2048  ;;  %p892_p4 = scmp.lt.u32.totalorder %s1087_s12, %s1268_s0 }
  0x17   : > { %p889_p2 = pnand %p888_p1, %p887_p0  ;;  %p893_p5 = scmp.lt.u32.totalorder %s891_s26, %s886_s17 }
  0x18   : > { %p895_p8 = scmp.lt.u32.totalorder %s886_s17, %s1087_s12 }
  0x19   : > { %p890_p3 = pneg %p889_p2  ;;  %p894_p7 = por %p893_p5, %p892_p4 }
  0x1b   : > { %p896_p10 = por %p895_p8, %p894_p7 }
  0x1d   : > { %p897_p9 = pnand %p896_p10, %p890_p3 }
  0x1f   : > { %900 = shalt.err (!%p897_p9)
}
  0x20   : > { %s901_s7 = scalar_lea.vmem %s1095_s14, 1024  ;;  %s984_s9 = smov [#allocation2]  }
  0x21   : > { %p902_p0 = scmp.ne.s32.totalorder %s1095_s14, %s901_s7  ;;  %s906_s10 = sshll.u32 %s984_s9, 4  ;;  %s907_s10 = int_to_ptr.vmem [resolvable:$false] %s906_s10 }
  0x22   : > { %s908_s11 = scalar_lea.vmem %s907_s10, 2048  ;;  %p909_p11 = scmp.lt.s32.totalorder %s1095_s14, %s907_s10 }
  0x23   : > { %p904_p2 = pnand %p902_p0, %p888_p1  ;;  %p910_p4 = scmp.lt.s32.totalorder %s908_s11, %s901_s7 }
  0x25   : > { %p905_p12 = pneg %p904_p2  ;;  %p911_p5 = por %p910_p4, %p909_p11 }
  0x27   : > { %p912_p7 = pnand %p911_p5, %p905_p12 }
  0x29   : > { %915 = shalt.err (!%p912_p7)
}
  0x2a   : > { %s985_s13 = smov 256   ;;  %s986_s17 = smov 16  }
  0x2b   : > { %823 = dma.hbm_to_vmem [thread:$0]  (!%p1091_p13), %s1087_s12, 1024, %s1095_s14, %s1097_s16, %s985_s13, %s985_s13, %s986_s17  }
  0x2c   : > { %p739_p9 = scmp.ge.s32.totalorder %s982_s21, 1  ;;  %p206_p1 = scmp.lt.s32.totalorder %s982_s21, 3 }
  0x2e   : > { %p207_p3 = pnand %p739_p9, %p206_p1 }
  0x2f   : > { %s1128_s23 = sand.u32 (!%p207_p3), 1, %s974_s19  }
  0x30   : > { %210 = sbr.rel (%p207_p3) target bundleno = 913 (0x391), region = 40  ;;  %s740_s25 = sshll.u32 (!%p207_p3), %s1128_s23, 6 }
  0x31   : > { %s213_s26 = scalar_lea.sflag (!%p207_p3), [#allocation3], %s1128_s23  ;;  %s216_s28 = scalar_lea.vmem (!%p207_p3), [#allocation2], %s740_s25 }
  0x37   : > { %961 = dma.done.wait (%p1067_p6), %s213_s26, 1024  }
  0x38   : > { %963 = vsyncadd (%p1067_p6), %s213_s26, 4294966272  ;;  %v1138_v0 = vld [vmem:[%s216_s28 + $0x20] sm:$0xff]  ;;  %v1140_v1 = vld [vmem:[%s216_s28 + $0x28] sm:$0xff]  ;;  %vm271_vm0 = vcmask 261120   ;;  %v987_v24 = vmov 0.0|0.0   ;;  %vm385_vm1 = vcmask 130048  }
  0x39   : > { %v1142_v2 = vld [vmem:[%s216_s28] sm:$0xff]  ;;  %v257_v3 = vadd.f32 %v1140_v1, %v1138_v0  ;;  %v1146_v4 = vld [vmem:[%s216_s28 + $0x8] sm:$0xff]  ;;  %v1148_v5 = vld [vmem:[%s216_s28 + $0x30] sm:$0xff]  ;;  %vm988_vm2 = vmmov 0   ;;  %v989_v26 = vmov 0.0   ;;  %v990_v27 = vmov 0  }
  0x3a   : > { %v1150_v6 = vld [vmem:[%s216_s28 + $0x38] sm:$0xff]  ;;  %v251_v7 = vadd.f32 %v1146_v4, %v1142_v2  ;;  %v1154_v8 = vld [vmem:[%s216_s28 + $0x10] sm:$0xff]  ;;  %v267_v12 = vld [vmem:[%s1269_s1] sm:$0xff]  ;;  %871 = vset.pattern.permute.xlu1 %v990_v27  ;;  %870 = vset.pattern.permute.xlu0 %v990_v27  ;;  %vm353_vm3 = vcmask 7168   ;;  %s757_s16 = sshll.u32 %s1045_s22, 10  ;;  %s242_s8 = scalar_lea.vmem [#allocation5], %s740_s25 }
  0x3b   : > { %v1156_v9 = vld [vmem:[%s216_s28 + $0x18] sm:$0xff]  ;;  %258 = vadd.xlane.f32.xlu1 %v257_v3  ;;  %v260_v10 = vadd.f32 %v1150_v6, %v1148_v5  ;;  %781 = vmatprep.mubr.msk.f32.mxu0 %vm271_vm0, %v267_v12  ;;  %v268_v23 = vld [vmem:[%s1269_s1 + $0x8] sm:$0xff]  ;;  %v381_v25 = vld [vmem:[%s1271_s3] sm:$0xff]  ;;  %s660_s7 = sshll.u32 %s242_s8, 4  ;;  %s1218_s11 = scalar_lea.hbm %s1273_s5, %s757_s16  ;;  %s1220_s7 = int_to_ptr.vmem [resolvable:$true] %s660_s7 }
  0x3c   : > { %252 = vadd.xlane.f32.xlu0 %v251_v7  ;;  %v254_v11 = vadd.f32 %v1156_v9, %v1154_v8  ;;  %788 = vmatprep.mubr.msk.f32.mxu1 %vm385_vm1, %v381_v25  ;;  %v270_v28 = vld [vmem:[%s1270_s2 + $0x8] sm:$0xff]  ;;  %v269_v29 = vld [vmem:[%s1270_s2] sm:$0xff]  ;;  %v383_v3 = vld [vmem:[%s1271_s3 + $0x10] sm:$0xff]  ;;  %s647_s22 = scalar_lea.sflag [#allocation4], %s1128_s23  ;;  %s916_s25 = scalar_lea.vmem %s1220_s7, 1024 }
  0x3d   : > { %v483_v62 = vld [vmem:[%s1272_s4] sm:$0x1]  ;;  %v382_v63 = vld [vmem:[%s1271_s3 + $0x8] sm:$0xff]  ;;  %v384_v7 = vld [vmem:[%s1271_s3 + $0x18] sm:$0xff]  ;;  %p917_p6 = scmp.ne.s32.totalorder %s1220_s7, %s916_s25  ;;  %p1280_p11 = scmp.ne.s32.totalorder %s1277_s30, 0 }
  0x3e   : > { %s991_s13 = smov [#allocation5]  }
  0x3f   : > { %261 = vadd.xlane.f32.xlu1 %v260_v10  ;;  %p918_p12 = pnand %p917_p6, %p1280_p11  ;;  %s920_s17 = sshll.u32 %s991_s13, 4  ;;  %s921_s17 = int_to_ptr.vmem [resolvable:$false] %s920_s17 }
  0x40   : > { %255 = vadd.xlane.f32.xlu0 %v254_v11  ;;  %s922_s26 = scalar_lea.vmem %s921_s17, 2048  ;;  %p923_p8 = scmp.lt.s32.totalorder %s1220_s7, %s921_s17 }
  0x41   : > { %p919_p13 = pneg %p918_p12  ;;  %p924_p10 = scmp.lt.s32.totalorder %s922_s26, %s916_s25 }
  0x43   : > { %p925_p0 = por %p924_p10, %p923_p8 }
  0x45   : > { %p926_p2 = pnand %p925_p0, %p919_p13 }
  0xc8   : > { %v259_v13 = vpop.xlane.xlu1 %258 }
  0xc9   : > { %v253_v14 = vpop.xlane.xlu0 %252  ;;  %v265_v17 = vmul.f32 0.00390625, %v259_v13 }
  0xca   : > { %v263_v18 = vmul.f32 0.00390625, %v253_v14 }
  0xcc   : > { %v262_v15 = vpop.xlane.xlu1 %261 }
  0xcd   : > { %v256_v16 = vpop.xlane.xlu0 %255  ;;  %v266_v19 = vmul.f32 0.00390625, %v262_v15 }
  0xce   : > { %v264_v20 = vmul.f32 0.00390625, %v256_v16 }
  0xcf   : > { %v805_v22 = vpack.c.bf16 %v266_v19, %v265_v17 }
  0xd0   : > { %v801_v21 = vpack.c.bf16 %v264_v20, %v263_v18 }
  0xd2   : > { %802 = vmatprep.subr.bf16.mxu0 %v801_v21 }
  0xd3   : > { %804 = vmatpush3.bf16.msra.mxu0 %v801_v21 }
  0xd4   : > { %806 = vmatprep.subr.bf16.mxu0 %v805_v22 }
  0xd7   : > { %808 = vmatpush3.bf16.msra.mxu0 %v805_v22 }
  0xd8   : > { %813 = vmatprep.subr.bf16.mxu0 %v987_v24 }
  0xda   : > { %782 = vmatmul.mubr.msk.f32.vlgmr.msra.gmra.mrb[0].mxu0 %vm271_vm0, %v268_v23 }
  0xdb   : > { %798 = vmatprep.mubr.msk.f32.mxu0 %vm988_vm2, %v989_v26 }
 0x1ad   : > { %v783_v30 = vpop.f32.mrb[0].mxu0 }
 0x1ae   : > { %v350_v31 = vadd.f32 %v783_v30, %v270_v28  ;;  %v344_v32 = vpop.f32.mrb[1].mxu0 }
 0x1af   : > { %v345_v33 = vadd.f32 %v344_v32, %v269_v29 }
 0x1b0   : > { %v355_v34 = vsel %vm353_vm3, %v350_v31, -inf }
 0x1b1   : > { %v354_v35 = vsel %vm353_vm3, %v345_v33, -inf }
 0x1b2   : > { %v356_v36 = vmax.f32 %v354_v35, %v355_v34 }
 0x1b4   : > { %v357_v37 = vrot.slane %v356_v36, 4 }
 0x1b6   : > { %v358_v38 = vmax.f32 %v356_v36, %v357_v37 }
 0x1b8   : > { %v359_v39 = vrot.slane %v358_v38, 2 }
 0x1ba   : > { %v360_v40 = vmax.f32 %v358_v38, %v359_v39 }
 0x1bc   : > { %v361_v41 = vrot.slane %v360_v40, 1 }
 0x1be   : > { %v362_v42 = vmax.f32 %v360_v40, %v361_v41 }
 0x1c0   : > { %v363_v43 = vsub.f32 %v345_v33, %v362_v42  ;;  %v364_v44 = vsub.f32 %v350_v31, %v362_v42 }
 0x1c2   : > { %v365_v45 = vmul.f32 1.442695, %v363_v43  ;;  %v367_v46 = vmul.f32 1.442695, %v364_v44 }
 0x1c4   : > { %872 = vpow2.f32 %v365_v45 }
 0x1c5   : > { %874 = vpow2.f32 %v367_v46 }
 0x1ce   : > { %v873_v47 = vpop.eup %872 }
 0x1cf   : > { %v875_v48 = vpop.eup %874  ;;  %v369_v49 = vsel %vm353_vm3, %v873_v47, 0.0 }
 0x1d0   : > { %v370_v50 = vsel %vm353_vm3, %v875_v48, 0.0 }
 0x1d1   : > { %v371_v51 = vadd.f32 %v370_v50, %v369_v49 }
 0x1d3   : > { %v372_v52 = vrot.slane %v371_v51, 4 }
 0x1d5   : > { %v373_v53 = vadd.f32 %v372_v52, %v371_v51 }
 0x1d7   : > { %v374_v54 = vrot.slane %v373_v53, 2 }
 0x1d9   : > { %v375_v55 = vadd.f32 %v374_v54, %v373_v53  ;;  %v622_v54 = vlaneseq }
 0x1db   : > { %v376_v56 = vrot.slane %v375_v55, 1 }
 0x1dd   : > { %v377_v57 = vadd.f32 %v376_v56, %v375_v55  ;;  %v623_v56 = vshrl.u32 %v622_v54, 7 }
 0x1df   : > { %876 = vrcp.f32 %v377_v57  ;;  %v624_v57 = vsub.s32 0, %v623_v56 }
 0x1e9   : > { %v877_v58 = vpop.eup %876 }
 0x1ea   : > { %v379_v59 = vmul.f32 %v877_v58, %v873_v47  ;;  %v380_v60 = vmul.f32 %v877_v58, %v875_v48 }
 0x1ec   : > { %v809_v61 = vpack.c.bf16 %v380_v60, %v379_v59 }
 0x1ee   : > { %810 = vmatprep.subr.bf16.mxu1 %v809_v61  ;;  %815 = vmatpush3.bf16.msra.mxu0 %v809_v61 }
 0x1ef   : > { %812 = vmatpush3.bf16.msra.mxu1 %v809_v61 }
 0x1f1   : > { %799 = vmatmul.mubr.msk.f32.vlgmr.msra.gmra.mrb[2].mxu0 %vm385_vm1, %v483_v62 }
 0x1f2   : > { %789 = vmatmul.mubr.msk.f32.vlgmr.msra.gmra.mrb[0].mxu1 %vm385_vm1, %v382_v63 }
 0x1f3   : > { %791 = vmatprep.mubr.msk.f32.mxu1 %vm385_vm1, %v383_v3 }
 0x1f6   : > { %792 = vmatmul.mubr.msk.f32.gmra.mrb[2].mxu1 %vm385_vm1, %v384_v7 }
 0x2c4   : > { %v553_v10 = vpop.f32.mrb[2].mxu0 }
 0x2c5   : > { %v790_v11 = vpop.f32.mrb[0].mxu1  ;;  %v800_v12 = vpop.f32.mrb[3].mxu0 }
 0x2c6   : > { %564 = vperm.xlu1 %871, %v790_v11   ;;  %v464_v13 = vpop.f32.mrb[1].mxu1 }
 0x2c7   : > { %559 = vperm.xlu0 %870, %v464_v13  }
 0x2c9   : > { %v793_v14 = vpop.f32.mrb[2].mxu1 }
 0x2ca   : > { %v474_v15 = vpop.f32.mrb[3].mxu1 }
 0x2cb   : > { %569 = vperm.xlu1 %871, %v474_v15  }
 0x2cf   : > { %574 = vperm.xlu1 %871, %v793_v14  }
 0x2d3   : > { %605 = vperm.xlu1 %871, %v553_v10  }
 0x345   : > { %v565_v16 = vpop.permute.xlu1 %564 }
 0x346   : > { %v560_v17 = vpop.permute.xlu0 %559  ;;  %v579_v18 = vmul.f32 %v565_v16, %v1154_v8  ;;  %v580_v19 = vmul.f32 %v565_v16, %v1156_v9 }
 0x347   : > { %v577_v20 = vmul.f32 %v560_v17, %v1142_v2  ;;  %v578_v21 = vmul.f32 %v560_v17, %v1146_v4 }
 0x349   : > { %v585_v25 = vadd.f32 %v579_v18, %v577_v20  ;;  %v594_v26 = vadd.f32 %v580_v19, %v578_v21 }
 0x34a   : > { %v570_v22 = vpop.permute.xlu1 %569 }
 0x34b   : > { %v581_v23 = vmul.f32 %v570_v22, %v1138_v0  ;;  %v582_v24 = vmul.f32 %v570_v22, %v1140_v1 }
 0x34d   : > { %v586_v28 = vadd.f32 %v585_v25, %v581_v23  ;;  %v595_v29 = vadd.f32 %v594_v26, %v582_v24 }
 0x34e   : > { %v575_v27 = vpop.permute.xlu1 %574 }
 0x34f   : > { %v583_v30 = vmul.f32 %v575_v27, %v1148_v5  ;;  %v584_v31 = vmul.f32 %v575_v27, %v1150_v6 }
 0x351   : > { %v587_v32 = vadd.f32 %v586_v28, %v583_v30  ;;  %v596_v33 = vadd.f32 %v595_v29, %v584_v31 }
 0x352   : > { %v606_v46 = vpop.permute.xlu1 %605 }
 0x353   : > { %v588_v34 = vrot.slane %v587_v32, 4  ;;  %v597_v35 = vrot.slane %v596_v33, 4 }
 0x355   : > { %v589_v36 = vadd.f32 %v588_v34, %v587_v32  ;;  %v598_v37 = vadd.f32 %v597_v35, %v596_v33 }
 0x357   : > { %v590_v38 = vrot.slane %v589_v36, 2  ;;  %v599_v39 = vrot.slane %v598_v37, 2 }
 0x359   : > { %v591_v40 = vadd.f32 %v590_v38, %v589_v36  ;;  %v600_v41 = vadd.f32 %v599_v39, %v598_v37 }
 0x35b   : > { %v592_v42 = vrot.slane %v591_v40, 1  ;;  %v601_v43 = vrot.slane %v600_v41, 1 }
 0x35d   : > { %v593_v44 = vadd.f32 %v592_v42, %v591_v40  ;;  %v602_v45 = vadd.f32 %v601_v43, %v600_v41 }
 0x35f   : > { %v608_v47 = vadd.f32 %v606_v46, %v593_v44  ;;  %v609_v48 = vadd.f32 %v606_v46, %v602_v45 }
 0x361   : > { %v749_v49 = vmul.f32 -1.442695, %v608_v47  ;;  %v750_v50 = vmul.f32 -1.442695, %v609_v48 }
 0x363   : > { %878 = vpow2.f32 %v749_v49 }
 0x364   : > { %880 = vpow2.f32 %v750_v50 }
 0x36d   : > { %v879_v51 = vpop.eup %878 }
 0x36e   : > { %v881_v52 = vpop.eup %880  ;;  %v616_v53 = vadd.f32 1.0, %v879_v51 }
 0x36f   : > { %v617_v55 = vadd.f32 1.0, %v881_v52 }
 0x370   : > { %882 = vrcp.f32 %v616_v53 }
 0x371   : > { %884 = vrcp.f32 %v617_v55 }
 0x37a   : > { %v883_v58 = vpop.eup %882 }
 0x37b   : > { %v885_v59 = vpop.eup %884  ;;  %v625_v60 = vrot.slane %v883_v58, %v624_v57 }
 0x37c   : > { %v629_v61 = vrot.slane %v885_v59, %v624_v57 }
 0x37d   : > { %v630_v62 = vmul.f32 %v625_v60, %v1142_v2  ;;  %v632_v63 = vmul.f32 %v625_v60, %v1154_v8  ;;  %v634_v3 = vmul.f32 %v625_v60, %v1138_v0  ;;  %v636_v7 = vmul.f32 %v625_v60, %v1148_v5 }
 0x37e   : > { %v631_v10 = vmul.f32 %v629_v61, %v1146_v4  ;;  %v633_v2 = vmul.f32 %v629_v61, %v1156_v9  ;;  %v635_v8 = vmul.f32 %v629_v61, %v1140_v1  ;;  %v637_v0 = vmul.f32 %v629_v61, %v1150_v6 }
 0x37f   : > { %638 = vst [vmem:[%s242_s8] sm:$0xff] %v630_v62  ;;  %640 = vst [vmem:[%s242_s8 + $0x10] sm:$0xff] %v632_v63 }
 0x380   : > { %642 = vst [vmem:[%s242_s8 + $0x20] sm:$0xff] %v634_v3  ;;  %644 = vst [vmem:[%s242_s8 + $0x30] sm:$0xff] %v636_v7 }
 0x381   : > { %639 = vst [vmem:[%s242_s8 + $0x8] sm:$0xff] %v631_v10  ;;  %641 = vst [vmem:[%s242_s8 + $0x18] sm:$0xff] %v633_v2 }
 0x382   : > { %643 = vst [vmem:[%s242_s8 + $0x28] sm:$0xff] %v635_v8  ;;  %645 = vst [vmem:[%s242_s8 + $0x38] sm:$0xff] %v637_v0 }
 0x383   : > { %929 = shalt.err (!%p926_p2)
}
 0x384   : > { %s930_s28 = scalar_lea.hbm %s1218_s11, 1024  ;;  %s934_s14 = scalar_lea.hbm %s1273_s5, 2048 }
 0x385   : > { %p931_p4 = scmp.ne.s32.totalorder %s1218_s11, %s930_s28  ;;  %p935_p9 = scmp.lt.u32.totalorder %s1218_s11, %s1273_s5 }
 0x386   : > { %p936_p1 = scmp.lt.u32.totalorder %s934_s14, %s930_s28  ;;  %p938_p6 = scmp.lt.u32.totalorder %s930_s28, %s1218_s11 }
 0x387   : > { %p932_p5 = pnand %p931_p4, %p1280_p11 }
 0x388   : > { %p937_p3 = por %p936_p1, %p935_p9 }
 0x389   : > { %p933_p7 = pneg %p932_p5 }
 0x38a   : > { %p939_p12 = por %p938_p6, %p937_p3 }
 0x38c   : > { %p940_p13 = pnand %p939_p12, %p933_p7 }
 0x38e   : > { %943 = shalt.err (!%p940_p13)
}
 0x38f   : > { %s992_s8 = smov 256   ;;  %s993_s9 = smov 16  }
 0x390   : > { %818 = dma.vmem_to_hbm [thread:$0]  (%p1280_p11), %s1220_s7, 1024, %s1218_s11, %s647_s22, %s992_s8, %s992_s8, %s993_s9  }
 0x391 PF: > { %s675_s10 = sand.u32 1, %s970_s18   ;;  %p1281_p8 = scmp.ne.s32.totalorder %s1278_s6, 0 }
 0x392   : > { %p1282_p10 = scmp.ge.s32.totalorder %s982_s21, 2  ;;  %s676_s25 = scalar_lea.sflag [#allocation4], %s675_s10 }
 0x394   : > { %p825_p0 = pnand %p1282_p10, %p1281_p8 }
 0x396   : > { %965 = dma.done.wait (!%p825_p0), %s676_s25, 1024  }
 0x397   : > { %967 = vsyncadd (!%p825_p0), %s676_s25, 4294966272  ;;  %p18_p2 = scmp.ge.s32.totalorder %s1049_s24, 4   ;;  %s1283_s18 = smov %s974_s19 }
 0x398   : > { %s1284_s19 = smov %s978_s20  ;;  %s1285_s20 = smov %s1061_s27 }
 0x399   : > { %s1286_s21 = smov %s1049_s24  ;;  %20 = sbr.rel (!%p18_p2) target bundleno = 5 (0x5), region = 85 }
 0x3a0   :  { %681 = vsyncpa [#allocation3], 1 }
 0x3a1   :  { %683 = vsyncpa [#allocation3 + $0x1], 1 }
 0x3a2   :  { %684 = vsyncpa [#allocation4], 1 }
 0x3a3   :  { %686 = vsyncpa [#allocation4 + $0x1], 1 }

</bundles_post_ra>
